<compile_context>
chip_gen: v7x
topology: tpu7x:2x2x1
jax: 0.10.0
libtpu: 0.0.40
codegen_flags: <defaults>
</compile_context>

<pallas_src>
import functools

import jax
import jax.numpy as jnp
from jax.experimental import pallas as pl
from jax.experimental.pallas import tpu as pltpu


def _nerf_loss_kernel(rgb_ref, tgt_ref, opacity_ref,
                      rgb_loss_ref, opacity_loss_ref,
                      *, lambda_opacity):
    # rgb loss: elementwise squared error (VPU)
    diff = rgb_ref[...] - tgt_ref[...]
    rgb_loss_ref[...] = diff * diff

    # opacity loss: lambda * (-o * log(o)), o = opacity + 1e-10 (log -> EUP slot)
    o = opacity_ref[...] + jnp.float32(1e-10)
    opacity_loss_ref[...] = jnp.float32(lambda_opacity) * (-o * jnp.log(o))


def nerf_loss(results_rgb, target_rgb, results_opacity,
              lambda_opacity=0.001, tile_rays=2048):
    """results_rgb, target_rgb: (N_rays, 3) f32; results_opacity: (N_rays, 1) f32.

    Returns {'rgb': (N_rays, 3), 'opacity': (N_rays, 1)} elementwise losses,
    matching the PyTorch module's default forward (all optional lambdas = 0).
    """
    n_rays = results_rgb.shape[0]

    # --- tile selection (rays per grid step) -------------------------------
    # Start from the requested tile size, then:
    #  * keep >= 2 grid steps when possible (lets v7x use both TensorCores),
    #  * balance rows across tiles so tail padding is <= 8 rows per tile.
    n_tiles = max(1, pl.cdiv(n_rays, int(tile_rays)))
    if n_rays >= 16 and n_tiles < 2:
        n_tiles = 2
    rows_per_tile = pl.cdiv(n_rays, n_tiles)
    tr = max(8, pl.cdiv(rows_per_tile, 8) * 8)     # sublane-aligned
    n_tiles = pl.cdiv(n_rays, tr)

    # Block shapes: last dim equals the full array dim (3 / 1), so no (8,128)
    # divisibility issue; row dim tr is a multiple of 8. No wrapper relayouts.
    rgb_spec = pl.BlockSpec((tr, 3), lambda i: (i, 0))
    opa_spec = pl.BlockSpec((tr, 1), lambda i: (i, 0))

    cost = pl.CostEstimate(
        flops=10 * n_rays,                # ~2 flops/elem * 3N (rgb) + ~4N (opacity)
        transcendentals=n_rays,           # one log per ray
        bytes_accessed=11 * n_rays * 4,   # (3+3+1) in + (3+1) out, f32
    )

    rgb_loss, opa_loss = pl.pallas_call(
        functools.partial(_nerf_loss_kernel,
                          lambda_opacity=float(lambda_opacity)),
        out_shape=(
            jax.ShapeDtypeStruct((n_rays, 3), jnp.float32),
            jax.ShapeDtypeStruct((n_rays, 1), jnp.float32),
        ),
        grid_spec=pl.GridSpec(
            grid=(n_tiles,),
            in_specs=[rgb_spec, rgb_spec, opa_spec],
            out_specs=(rgb_spec, opa_spec),
        ),
        compiler_params=pltpu.CompilerParams(
            dimension_semantics=("parallel",)),
        cost_estimate=cost,
    )(results_rgb, target_rgb, results_opacity)

    return {"rgb": rgb_loss, "opacity": opa_loss}


if __name__ == "__main__":
    key = jax.random.PRNGKey(0)
    k1, k2, k3 = jax.random.split(key, 3)

    n_rays = 300  # deliberately NOT a multiple of 8/128 (exercises ragged blocks)
    results_rgb = jax.random.uniform(k1, (n_rays, 3), dtype=jnp.float32)
    target_rgb = jax.random.uniform(k2, (n_rays, 3), dtype=jnp.float32)
    # opacity in (0, 1)
    results_opacity = jax.random.uniform(
        k3, (n_rays, 1), dtype=jnp.float32, minval=0.01, maxval=0.99)

    loss = nerf_loss(results_rgb, target_rgb, results_opacity,
                     lambda_opacity=0.001)
    jax.block_until_ready(loss)

    # reference check (plain JAX)
    ref_rgb = (results_rgb - target_rgb) ** 2
    o = results_opacity + 1e-10
    ref_opacity = 0.001 * (-o * jnp.log(o))
    assert loss["rgb"].shape == (n_rays, 3)
    assert loss["opacity"].shape == (n_rays, 1)
    assert jnp.allclose(loss["rgb"], ref_rgb, atol=1e-6)
    assert jnp.allclose(loss["opacity"], ref_opacity, atol=1e-6)

    print("KERNEL_OK")
</pallas_src>

<mosaic_0001>
module attributes {stable_mosaic.version = 11 : i64} {
  func.func @_nerf_loss_kernel(%arg0: i32, %arg1: memref<152x3xf32, #tpu.memory_space<vmem>>, %arg2: memref<152x3xf32, #tpu.memory_space<vmem>>, %arg3: memref<152x1xf32, #tpu.memory_space<vmem>>, %arg4: memref<152x3xf32, #tpu.memory_space<vmem>>, %arg5: memref<152x1xf32, #tpu.memory_space<vmem>>) attributes {dimension_semantics = [#tpu.dimension_semantics<parallel>], iteration_bounds = array<i64: 2>, scalar_prefetch = 0 : i64, scratch_operands = 0 : i64, tpu.core_type = #tpu.core_type<tc>, window_params = [{transform_indices = @transform_0, window_bounds = array<i64: 152, 3>}, {transform_indices = @transform_1, window_bounds = array<i64: 152, 3>}, {transform_indices = @transform_2, window_bounds = array<i64: 152, 1>}, {transform_indices = @transform_3, window_bounds = array<i64: 152, 3>}, {transform_indices = @transform_4, window_bounds = array<i64: 152, 1>}]} {
    %c0 = arith.constant 0 : index
    %c0_0 = arith.constant 0 : index
    %0 = vector.load %arg1[%c0, %c0_0] : memref<152x3xf32, #tpu.memory_space<vmem>>, vector<152x3xf32>
    %c0_1 = arith.constant 0 : index
    %c0_2 = arith.constant 0 : index
    %1 = vector.load %arg2[%c0_1, %c0_2] : memref<152x3xf32, #tpu.memory_space<vmem>>, vector<152x3xf32>
    %2 = arith.subf %0, %1 : vector<152x3xf32>
    %3 = arith.mulf %2, %2 : vector<152x3xf32>
    %c0_3 = arith.constant 0 : index
    %c0_4 = arith.constant 0 : index
    %4 = vector.load %arg4[%c0_3, %c0_4] : memref<152x3xf32, #tpu.memory_space<vmem>>, vector<152x3xf32>
    tpu.vector_store %arg4[%c0_3, %c0_4], %3 {strides = array<i32>} : memref<152x3xf32, #tpu.memory_space<vmem>>, vector<152x3xf32>,
    %c0_5 = arith.constant 0 : index
    %c0_6 = arith.constant 0 : index
    %5 = vector.load %arg3[%c0_5, %c0_6] : memref<152x1xf32, #tpu.memory_space<vmem>>, vector<152x1xf32>
    %cst = arith.constant 1.000000e-10 : f32
    %6 = vector.broadcast %cst : f32 to vector<152x1xf32>
    %7 = arith.addf %5, %6 : vector<152x1xf32>
    %cst_7 = arith.constant 0.000000e+00 : f32
    %8 = vector.broadcast %cst_7 : f32 to vector<152x1xf32>
    %9 = arith.subf %8, %7 : vector<152x1xf32>
    %10 = math.log %7 : vector<152x1xf32>
    %11 = arith.mulf %9, %10 : vector<152x1xf32>
    %cst_8 = arith.constant 1.000000e-03 : f32
    %12 = vector.broadcast %cst_8 : f32 to vector<152x1xf32>
    %13 = arith.mulf %12, %11 : vector<152x1xf32>
    %c0_9 = arith.constant 0 : index
    %c0_10 = arith.constant 0 : index
    %14 = vector.load %arg5[%c0_9, %c0_10] : memref<152x1xf32, #tpu.memory_space<vmem>>, vector<152x1xf32>
    tpu.vector_store %arg5[%c0_9, %c0_10], %13 {strides = array<i32>} : memref<152x1xf32, #tpu.memory_space<vmem>>, vector<152x1xf32>,
    return
  }
  func.func @transform_0(%arg0: i32) -> (i32, i32) {
    %c0_i32 = arith.constant 0 : i32
    %c0_i32_0 = arith.constant 0 : i32
    return %arg0, %c0_i32 : i32, i32
  }
  func.func @transform_1(%arg0: i32) -> (i32, i32) {
    %c0_i32 = arith.constant 0 : i32
    %c0_i32_0 = arith.constant 0 : i32
    return %arg0, %c0_i32 : i32, i32
  }
  func.func @transform_2(%arg0: i32) -> (i32, i32) {
    %c0_i32 = arith.constant 0 : i32
    %c0_i32_0 = arith.constant 0 : i32
    return %arg0, %c0_i32 : i32, i32
  }
  func.func @transform_3(%arg0: i32) -> (i32, i32) {
    %c0_i32 = arith.constant 0 : i32
    %c0_i32_0 = arith.constant 0 : i32
    return %arg0, %c0_i32 : i32, i32
  }
  func.func @transform_4(%arg0: i32) -> (i32, i32) {
    %c0_i32 = arith.constant 0 : i32
    %c0_i32_0 = arith.constant 0 : i32
    return %arg0, %c0_i32 : i32, i32
  }
}

</mosaic_0001>

<bundles_post_ra>
// kernel: tpu_custom_call.1
= control target key start
LH: loop header
LB: loop body
LE: loop exit
PB: predicated region body
PF: predicated region fallthrough
CT: control target
= control target key end

     0   :  { %s713_s15 = smov 0   ;;  %s965_s0 = inlined_call_operand.vmem [shape: f32[300,3], index: 0, kind: input, shape index: {}]   ;;  %s966_s1 = inlined_call_operand.vmem [shape: f32[300,3], index: 1, kind: input, shape index: {}]   ;;  %s967_s2 = inlined_call_operand.vmem [shape: f32[300,1], index: 2, kind: input, shape index: {}]   ;;  %s968_s3 = inlined_call_operand.vmem [shape: f32[300,3], index: 3, kind: output, shape index: {0}]   ;;  %s969_s4 = inlined_call_operand.vmem [shape: f32[300,1], index: 4, kind: output, shape index: {1}]  }
   0x1 LB: > { %s622_s16 = sadd.s32 4294967295, %s686_s15   ;;  %p626_p0 = scmp.ge.s32.totalorder %s686_s15, 1  ;;  %s686_s15 = sphi %s713_s15, %s15_s15  }
   0x2   : > { %p188_p1 = scmp.lt.s32.totalorder %s686_s15, 3 }
   0x4   : > { %p189_p2 = pnand %p626_p0, %p188_p1 }
   0x5   : > { %s229_s17 = smul.u32 (!%p189_p2), 19, %s622_s16  ;;  %vm335_vm0 = vcmask (!%p189_p2), 23552   ;;  %vm488_vm1 = vcmask (!%p189_p2), 7168  }
   0x6   : > { %192 = sbr.rel (%p189_p2) target bundleno = 68 (0x44), region = 32 }
   0x7   : > { %p230_p3 = scmp.lt.s32.totalorder (!%p189_p2), %s229_s17, 37 }
   0xd   : > { %s971_s17 = smov (!%p230_p3, %s229_s17), 37 }
   0xe   : > { %s721_s18 = sshll.u32 %s971_s17, 3 }
   0xf   : > { %s727_s21 = scalar_lea.vmem %s965_s0, %s721_s18  ;;  %s733_s24 = scalar_lea.vmem %s966_s1, %s721_s18 }
  0x10   : > { %v259_v0 = vld [vmem:[%s727_s21] sm:$0xff]  ;;  %v260_v2 = vld [vmem:[%s727_s21 + $0x8] sm:$0xff]  ;;  %v261_v5 = vld [vmem:[%s727_s21 + $0x10] sm:$0xff]  ;;  %s745_s27 = scalar_lea.vmem %s968_s3, %s721_s18  ;;  %s789_s30 = scalar_lea.vmem %s967_s2, %s721_s18 }
  0x11   : > { %v278_v1 = vld [vmem:[%s733_s24] sm:$0xff]  ;;  %v279_v4 = vld [vmem:[%s733_s24 + $0x8] sm:$0xff]  ;;  %v280_v6 = vld [vmem:[%s733_s24 + $0x10] sm:$0xff]  ;;  %s906_s7 = scalar_lea.vmem %s969_s4, %s721_s18 }
  0x12   : > { %v297_v3 = vsub.f32 %v259_v0, %v278_v1  ;;  %v298_v7 = vsub.f32 %v260_v2, %v279_v4  ;;  %v299_v8 = vsub.f32 %v261_v5, %v280_v6  ;;  %v262_v9 = vld [vmem:[%s727_s21 + $0x18] sm:$0xff]  ;;  %v263_v11 = vld [vmem:[%s727_s21 + $0x20] sm:$0xff]  ;;  %v264_v15 = vld [vmem:[%s727_s21 + $0x28] sm:$0xff] }
  0x13   : > { %v281_v10 = vld [vmem:[%s733_s24 + $0x18] sm:$0xff]  ;;  %v282_v14 = vld [vmem:[%s733_s24 + $0x20] sm:$0xff]  ;;  %v283_v16 = vld [vmem:[%s733_s24 + $0x28] sm:$0xff] }
  0x14   : > { %v316_v12 = vmul.f32 %v297_v3, %v297_v3  ;;  %v300_v13 = vsub.f32 %v262_v9, %v281_v10  ;;  %v317_v17 = vmul.f32 %v298_v7, %v298_v7  ;;  %v318_v18 = vmul.f32 %v299_v8, %v299_v8  ;;  %v265_v21 = vld [vmem:[%s727_s21 + $0x30] sm:$0xff]  ;;  %v266_v23 = vld [vmem:[%s727_s21 + $0x38] sm:$0xff]  ;;  %v267_v27 = vld [vmem:[%s727_s21 + $0x40] sm:$0xff] }
  0x15   : > { %v301_v19 = vsub.f32 %v263_v11, %v282_v14  ;;  %v302_v20 = vsub.f32 %v264_v15, %v283_v16  ;;  %v284_v22 = vld [vmem:[%s733_s24 + $0x30] sm:$0xff]  ;;  %v285_v26 = vld [vmem:[%s733_s24 + $0x38] sm:$0xff]  ;;  %v286_v28 = vld [vmem:[%s733_s24 + $0x40] sm:$0xff] }
  0x16   : > { %336 = vst.msk [vmem:[%s745_s27] sm:$0xff] %vm335_vm0, %v316_v12  ;;  %v319_v24 = vmul.f32 %v300_v13, %v300_v13  ;;  %v303_v25 = vsub.f32 %v265_v21, %v284_v22  ;;  %337 = vst.msk [vmem:[%s745_s27 + $0x8] sm:$0xff] %vm335_vm0, %v317_v17  ;;  %v304_v31 = vsub.f32 %v266_v23, %v285_v26  ;;  %v268_v33 = vld [vmem:[%s727_s21 + $0x48] sm:$0xff]  ;;  %v269_v35 = vld [vmem:[%s727_s21 + $0x50] sm:$0xff] }
  0x17   : > { %338 = vst.msk [vmem:[%s745_s27 + $0x10] sm:$0xff] %vm335_vm0, %v318_v18  ;;  %v320_v29 = vmul.f32 %v301_v19, %v301_v19  ;;  %v321_v30 = vmul.f32 %v302_v20, %v302_v20  ;;  %v305_v32 = vsub.f32 %v267_v27, %v286_v28  ;;  %v287_v34 = vld [vmem:[%s733_s24 + $0x48] sm:$0xff]  ;;  %v288_v38 = vld [vmem:[%s733_s24 + $0x50] sm:$0xff]  ;;  %v270_v39 = vld [vmem:[%s727_s21 + $0x58] sm:$0xff] }
  0x18   : > { %339 = vst.msk [vmem:[%s745_s27 + $0x18] sm:$0xff] %vm335_vm0, %v319_v24  ;;  %v322_v36 = vmul.f32 %v303_v25, %v303_v25  ;;  %v306_v37 = vsub.f32 %v268_v33, %v287_v34  ;;  %v289_v40 = vld [vmem:[%s733_s24 + $0x58] sm:$0xff]  ;;  %v323_v41 = vmul.f32 %v304_v31, %v304_v31  ;;  %v307_v43 = vsub.f32 %v269_v35, %v288_v38  ;;  %v271_v45 = vld [vmem:[%s727_s21 + $0x60] sm:$0xff]  ;;  %v272_v47 = vld [vmem:[%s727_s21 + $0x68] sm:$0xff] }
  0x19   : > { %340 = vst.msk [vmem:[%s745_s27 + $0x20] sm:$0xff] %vm335_vm0, %v320_v29  ;;  %341 = vst.msk [vmem:[%s745_s27 + $0x28] sm:$0xff] %vm335_vm0, %v321_v30  ;;  %v324_v42 = vmul.f32 %v305_v32, %v305_v32  ;;  %v308_v44 = vsub.f32 %v270_v39, %v289_v40  ;;  %v290_v46 = vld [vmem:[%s733_s24 + $0x60] sm:$0xff]  ;;  %v291_v50 = vld [vmem:[%s733_s24 + $0x68] sm:$0xff] }
  0x1a   : > { %342 = vst.msk [vmem:[%s745_s27 + $0x30] sm:$0xff] %vm335_vm0, %v322_v36  ;;  %v325_v48 = vmul.f32 %v306_v37, %v306_v37  ;;  %v309_v49 = vsub.f32 %v271_v45, %v290_v46  ;;  %v273_v51 = vld [vmem:[%s727_s21 + $0x70] sm:$0xff]  ;;  %343 = vst.msk [vmem:[%s745_s27 + $0x38] sm:$0xff] %vm335_vm0, %v323_v41  ;;  %v326_v53 = vmul.f32 %v307_v43, %v307_v43  ;;  %v274_v57 = vld [vmem:[%s727_s21 + $0x78] sm:$0xff] }
  0x1b   : > { %v292_v52 = vld [vmem:[%s733_s24 + $0x70] sm:$0xff]  ;;  %344 = vst.msk [vmem:[%s745_s27 + $0x40] sm:$0xff] %vm335_vm0, %v324_v42  ;;  %v327_v54 = vmul.f32 %v308_v44, %v308_v44  ;;  %v310_v55 = vsub.f32 %v272_v47, %v291_v50  ;;  %v293_v58 = vld [vmem:[%s733_s24 + $0x78] sm:$0xff]  ;;  %v275_v59 = vld [vmem:[%s727_s21 + $0x80] sm:$0xff] }
  0x1c   : > { %v311_v56 = vsub.f32 %v273_v51, %v292_v52  ;;  %345 = vst.msk [vmem:[%s745_s27 + $0x48] sm:$0xff] %vm335_vm0, %v325_v48  ;;  %v328_v60 = vmul.f32 %v309_v49, %v309_v49  ;;  %v312_v61 = vsub.f32 %v274_v57, %v293_v58  ;;  %v294_v62 = vld [vmem:[%s733_s24 + $0x80] sm:$0xff]  ;;  %v276_v63 = vld [vmem:[%s727_s21 + $0x88] sm:$0xff]  ;;  %346 = vst.msk [vmem:[%s745_s27 + $0x50] sm:$0xff] %vm335_vm0, %v326_v53 }
  0x1d   : > { %v295_v0 = vld [vmem:[%s733_s24 + $0x88] sm:$0xff]  ;;  %347 = vst.msk [vmem:[%s745_s27 + $0x58] sm:$0xff] %vm335_vm0, %v327_v54  ;;  %v329_v1 = vmul.f32 %v310_v55, %v310_v55  ;;  %v313_v3 = vsub.f32 %v275_v59, %v294_v62  ;;  %v277_v5 = vld [vmem:[%s727_s21 + $0x90] sm:$0xff]  ;;  %v355_v7 = vld [vmem:[%s789_s30] sm:$0xff] }
  0x1e   : > { %v330_v2 = vmul.f32 %v311_v56, %v311_v56  ;;  %v314_v4 = vsub.f32 %v276_v63, %v295_v0  ;;  %v296_v6 = vld [vmem:[%s733_s24 + $0x90] sm:$0xff]  ;;  %348 = vst.msk [vmem:[%s745_s27 + $0x60] sm:$0xff] %vm335_vm0, %v328_v60  ;;  %v331_v8 = vmul.f32 %v312_v61, %v312_v61  ;;  %v812_v10 = vadd.f32 1e-10, %v355_v7  ;;  %v356_v11 = vld [vmem:[%s789_s30 + $0x8] sm:$0xff]  ;;  %v358_v13 = vld [vmem:[%s789_s30 + $0x18] sm:$0xff] }
  0x1f   : > { %v315_v9 = vsub.f32 %v277_v5, %v296_v6  ;;  %v357_v12 = vld [vmem:[%s789_s30 + $0x10] sm:$0xff]  ;;  %349 = vst.msk [vmem:[%s745_s27 + $0x68] sm:$0xff] %vm335_vm0, %v329_v1  ;;  %v332_v14 = vmul.f32 %v313_v3, %v313_v3  ;;  %v821_v16 = vadd.f32 1e-10, %v356_v11  ;;  %v359_v18 = vld [vmem:[%s789_s30 + $0x20] sm:$0xff]  ;;  %v360_v19 = vld [vmem:[%s789_s30 + $0x28] sm:$0xff] }
  0x20   : > { %350 = vst.msk [vmem:[%s745_s27 + $0x70] sm:$0xff] %vm335_vm0, %v330_v2  ;;  %v333_v15 = vmul.f32 %v314_v4, %v314_v4  ;;  %v823_v17 = vadd.f32 1e-10, %v357_v12  ;;  %351 = vst.msk [vmem:[%s745_s27 + $0x78] sm:$0xff] %vm335_vm0, %v331_v8  ;;  %642 = vlog2.f32 %v812_v10  ;;  %v830_v21 = vadd.f32 1e-10, %v358_v13 }
  0x21   : > { %v334_v20 = vmul.f32 %v315_v9, %v315_v9  ;;  %v361_v22 = vld [vmem:[%s789_s30 + $0x30] sm:$0xff]  ;;  %v362_v23 = vld [vmem:[%s789_s30 + $0x38] sm:$0xff]  ;;  %352 = vst.msk [vmem:[%s745_s27 + $0x80] sm:$0xff] %vm335_vm0, %v332_v14  ;;  %644 = vlog2.f32 %v821_v16  ;;  %v839_v24 = vadd.f32 1e-10, %v359_v18  ;;  %v363_v25 = vld [vmem:[%s789_s30 + $0x40] sm:$0xff] }
  0x22   : > { %353 = vst.msk [vmem:[%s745_s27 + $0x88] sm:$0xff] %vm335_vm0, %v333_v15  ;;  %646 = vlog2.f32 %v823_v17  ;;  %v845_v26 = vadd.f32 1e-10, %v360_v19  ;;  %v847_v27 = vadd.f32 1e-10, %v361_v22  ;;  %v364_v28 = vld [vmem:[%s789_s30 + $0x48] sm:$0xff] }
  0x23   : > { %354 = vst.msk [vmem:[%s745_s27 + $0x90] sm:$0xff] %vm335_vm0, %v334_v20  ;;  %648 = vlog2.f32 %v830_v21  ;;  %v851_v29 = vadd.f32 1e-10, %v362_v23  ;;  %v365_v30 = vld [vmem:[%s789_s30 + $0x50] sm:$0xff]  ;;  %v855_v31 = vadd.f32 1e-10, %v363_v25 }
  0x24   : > { %650 = vlog2.f32 %v839_v24  ;;  %v366_v32 = vld [vmem:[%s789_s30 + $0x58] sm:$0xff]  ;;  %v859_v33 = vadd.f32 1e-10, %v364_v28  ;;  %v367_v34 = vld [vmem:[%s789_s30 + $0x60] sm:$0xff]  ;;  %v863_v35 = vadd.f32 1e-10, %v365_v30 }
  0x25   : > { %652 = vlog2.f32 %v845_v26  ;;  %v368_v36 = vld [vmem:[%s789_s30 + $0x68] sm:$0xff]  ;;  %v393_v37 = vsub.f32 0.0, %v812_v10  ;;  %v394_v38 = vsub.f32 0.0, %v821_v16  ;;  %v869_v39 = vadd.f32 1e-10, %v366_v32  ;;  %v369_v40 = vld [vmem:[%s789_s30 + $0x70] sm:$0xff] }
  0x26   : > { %654 = vlog2.f32 %v847_v27  ;;  %v395_v41 = vsub.f32 0.0, %v823_v17  ;;  %v396_v42 = vsub.f32 0.0, %v830_v21  ;;  %v875_v43 = vadd.f32 1e-10, %v367_v34  ;;  %v370_v44 = vld [vmem:[%s789_s30 + $0x78] sm:$0xff]  ;;  %v371_v48 = vld [vmem:[%s789_s30 + $0x80] sm:$0xff] }
  0x27   : > { %656 = vlog2.f32 %v851_v29  ;;  %v397_v45 = vsub.f32 0.0, %v839_v24  ;;  %v398_v46 = vsub.f32 0.0, %v845_v26  ;;  %v881_v47 = vadd.f32 1e-10, %v368_v36  ;;  %v372_v53 = vld [vmem:[%s789_s30 + $0x88] sm:$0xff]  ;;  %v373_v58 = vld [vmem:[%s789_s30 + $0x90] sm:$0xff] }
  0x28   : > { %658 = vlog2.f32 %v855_v31  ;;  %v399_v50 = vsub.f32 0.0, %v847_v27  ;;  %v400_v51 = vsub.f32 0.0, %v851_v29  ;;  %v887_v52 = vadd.f32 1e-10, %v369_v40 }
  0x29   : > { %660 = vlog2.f32 %v859_v33  ;;  %v401_v56 = vsub.f32 0.0, %v855_v31  ;;  %v892_v57 = vadd.f32 1e-10, %v370_v44  ;;  %v402_v61 = vsub.f32 0.0, %v859_v33 }
  0x2a   : > { %v643_v49 = vpop.eup %642  ;;  %662 = vlog2.f32 %v863_v35  ;;  %v897_v62 = vadd.f32 1e-10, %v371_v48  ;;  %v900_v2 = vadd.f32 1e-10, %v372_v53  ;;  %v909_v6 = vadd.f32 1e-10, %v373_v58 }
  0x2b   : > { %v645_v54 = vpop.eup %644  ;;  %v413_v55 = vmul.f32 0.6931472, %v643_v49  ;;  %664 = vlog2.f32 %v869_v39  ;;  %v403_v27 = vsub.f32 0.0, %v863_v35  ;;  %v404_v32 = vsub.f32 0.0, %v869_v39 }
  0x2c   : > { %v647_v59 = vpop.eup %646  ;;  %v415_v60 = vmul.f32 0.6931472, %v645_v54  ;;  %666 = vlog2.f32 %v875_v43  ;;  %v406_v44 = vsub.f32 0.0, %v881_v47  ;;  %v407_v49 = vsub.f32 0.0, %v887_v52 }
  0x2d   : > { %v649_v63 = vpop.eup %648  ;;  %v450_v0 = vmul.f32 %v413_v55, %v393_v37  ;;  %v417_v1 = vmul.f32 0.6931472, %v647_v59  ;;  %668 = vlog2.f32 %v881_v47  ;;  %v408_v54 = vsub.f32 0.0, %v892_v57 }
  0x2e   : > { %v651_v3 = vpop.eup %650  ;;  %v451_v4 = vmul.f32 %v415_v60, %v394_v38  ;;  %v419_v5 = vmul.f32 0.6931472, %v649_v63  ;;  %670 = vlog2.f32 %v887_v52  ;;  %v405_v38 = vsub.f32 0.0, %v875_v43 }
  0x2f   : > { %v653_v7 = vpop.eup %652  ;;  %v469_v8 = vmul.f32 0.001, %v450_v0  ;;  %v452_v9 = vmul.f32 %v417_v1, %v395_v41  ;;  %v421_v10 = vmul.f32 0.6931472, %v651_v3  ;;  %672 = vlog2.f32 %v892_v57 }
  0x30   : > { %v655_v11 = vpop.eup %654  ;;  %v470_v12 = vmul.f32 0.001, %v451_v4  ;;  %v453_v13 = vmul.f32 %v419_v5, %v396_v42  ;;  %v423_v14 = vmul.f32 0.6931472, %v653_v7  ;;  %674 = vlog2.f32 %v897_v62 }
  0x31   : > { %v657_v15 = vpop.eup %656  ;;  %489 = vst.msk [vmem:[%s906_s7] sm:$0xff] %vm488_vm1, %v469_v8  ;;  %v471_v16 = vmul.f32 0.001, %v452_v9  ;;  %v454_v17 = vmul.f32 %v421_v10, %v397_v45  ;;  %v425_v18 = vmul.f32 0.6931472, %v655_v11  ;;  %676 = vlog2.f32 %v900_v2 }
  0x32   : > { %v659_v19 = vpop.eup %658  ;;  %490 = vst.msk [vmem:[%s906_s7 + $0x8] sm:$0xff] %vm488_vm1, %v470_v12  ;;  %v472_v20 = vmul.f32 0.001, %v453_v13  ;;  %v455_v21 = vmul.f32 %v423_v14, %v398_v46  ;;  %v427_v22 = vmul.f32 0.6931472, %v657_v15  ;;  %678 = vlog2.f32 %v909_v6 }
  0x33   : > { %v661_v23 = vpop.eup %660  ;;  %491 = vst.msk [vmem:[%s906_s7 + $0x10] sm:$0xff] %vm488_vm1, %v471_v16  ;;  %v473_v24 = vmul.f32 0.001, %v454_v17  ;;  %v456_v25 = vmul.f32 %v425_v18, %v399_v50  ;;  %v429_v26 = vmul.f32 0.6931472, %v659_v19  ;;  %v409_v59 = vsub.f32 0.0, %v897_v62 }
  0x34   : > { %v663_v28 = vpop.eup %662  ;;  %492 = vst.msk [vmem:[%s906_s7 + $0x18] sm:$0xff] %vm488_vm1, %v472_v20  ;;  %v474_v29 = vmul.f32 0.001, %v455_v21  ;;  %v457_v30 = vmul.f32 %v427_v22, %v400_v51  ;;  %v431_v31 = vmul.f32 0.6931472, %v661_v23  ;;  %v410_v0 = vsub.f32 0.0, %v900_v2 }
  0x35   : > { %v665_v33 = vpop.eup %664  ;;  %493 = vst.msk [vmem:[%s906_s7 + $0x20] sm:$0xff] %vm488_vm1, %v473_v24  ;;  %v475_v34 = vmul.f32 0.001, %v456_v25  ;;  %v458_v36 = vmul.f32 %v429_v26, %v401_v56  ;;  %v433_v37 = vmul.f32 0.6931472, %v663_v28  ;;  %v411_v5 = vsub.f32 0.0, %v909_v6 }
  0x36   : > { %v667_v40 = vpop.eup %666  ;;  %494 = vst.msk [vmem:[%s906_s7 + $0x28] sm:$0xff] %vm488_vm1, %v474_v29  ;;  %v476_v35 = vmul.f32 0.001, %v457_v30  ;;  %v459_v41 = vmul.f32 %v431_v31, %v402_v61  ;;  %v435_v42 = vmul.f32 0.6931472, %v665_v33 }
  0x37   : > { %v669_v45 = vpop.eup %668  ;;  %495 = vst.msk [vmem:[%s906_s7 + $0x30] sm:$0xff] %vm488_vm1, %v475_v34  ;;  %v477_v39 = vmul.f32 0.001, %v458_v36  ;;  %v460_v46 = vmul.f32 %v433_v37, %v403_v27  ;;  %v437_v48 = vmul.f32 0.6931472, %v667_v40 }
  0x38   : > { %v671_v50 = vpop.eup %670  ;;  %496 = vst.msk [vmem:[%s906_s7 + $0x38] sm:$0xff] %vm488_vm1, %v476_v35  ;;  %v478_v43 = vmul.f32 0.001, %v459_v41  ;;  %v461_v51 = vmul.f32 %v435_v42, %v404_v32  ;;  %v439_v53 = vmul.f32 0.6931472, %v669_v45 }
  0x39   : > { %v673_v55 = vpop.eup %672  ;;  %497 = vst.msk [vmem:[%s906_s7 + $0x40] sm:$0xff] %vm488_vm1, %v477_v39  ;;  %v479_v47 = vmul.f32 0.001, %v460_v46  ;;  %v462_v56 = vmul.f32 %v437_v48, %v405_v38  ;;  %v441_v58 = vmul.f32 0.6931472, %v671_v50 }
  0x3a   : > { %v675_v60 = vpop.eup %674  ;;  %498 = vst.msk [vmem:[%s906_s7 + $0x48] sm:$0xff] %vm488_vm1, %v478_v43  ;;  %v480_v52 = vmul.f32 0.001, %v461_v51  ;;  %v463_v61 = vmul.f32 %v439_v53, %v406_v44  ;;  %v443_v63 = vmul.f32 0.6931472, %v673_v55 }
  0x3b   : > { %v677_v57 = vpop.eup %676  ;;  %499 = vst.msk [vmem:[%s906_s7 + $0x50] sm:$0xff] %vm488_vm1, %v479_v47  ;;  %v481_v1 = vmul.f32 0.001, %v462_v56  ;;  %v464_v3 = vmul.f32 %v441_v58, %v407_v49  ;;  %v445_v4 = vmul.f32 0.6931472, %v675_v60 }
  0x3c   : > { %v679_v62 = vpop.eup %678  ;;  %500 = vst.msk [vmem:[%s906_s7 + $0x58] sm:$0xff] %vm488_vm1, %v480_v52  ;;  %v482_v7 = vmul.f32 0.001, %v463_v61  ;;  %v465_v8 = vmul.f32 %v443_v63, %v408_v54  ;;  %v447_v9 = vmul.f32 0.6931472, %v677_v57 }
  0x3d   : > { %501 = vst.msk [vmem:[%s906_s7 + $0x60] sm:$0xff] %vm488_vm1, %v481_v1  ;;  %v483_v2 = vmul.f32 0.001, %v464_v3  ;;  %v466_v10 = vmul.f32 %v445_v4, %v409_v59  ;;  %v449_v11 = vmul.f32 0.6931472, %v679_v62 }
  0x3e   : > { %502 = vst.msk [vmem:[%s906_s7 + $0x68] sm:$0xff] %vm488_vm1, %v482_v7  ;;  %v484_v12 = vmul.f32 0.001, %v465_v8  ;;  %v467_v13 = vmul.f32 %v447_v9, %v410_v0 }
  0x3f   : > { %503 = vst.msk [vmem:[%s906_s7 + $0x70] sm:$0xff] %vm488_vm1, %v483_v2  ;;  %v485_v6 = vmul.f32 0.001, %v466_v10  ;;  %v468_v14 = vmul.f32 %v449_v11, %v411_v5 }
  0x40   : > { %504 = vst.msk [vmem:[%s906_s7 + $0x78] sm:$0xff] %vm488_vm1, %v484_v12  ;;  %v486_v15 = vmul.f32 0.001, %v467_v13 }
  0x41   : > { %505 = vst.msk [vmem:[%s906_s7 + $0x80] sm:$0xff] %vm488_vm1, %v485_v6  ;;  %v487_v16 = vmul.f32 0.001, %v468_v14 }
  0x42   : > { %506 = vst.msk [vmem:[%s906_s7 + $0x88] sm:$0xff] %vm488_vm1, %v486_v15 }
  0x43   : > { %507 = vst.msk [vmem:[%s906_s7 + $0x90] sm:$0xff] %vm488_vm1, %v487_v16 }
  0x44 PF: > { %s15_s15 = sadd.s32 1, %s686_s15  }
  0x45   : > { %p12_p4 = scmp.ge.s32.totalorder %s15_s15, 4  }
  0x47   :  { %14 = sbr.rel (!%p12_p4) target bundleno = 1 (0x1), region = 80 }

</bundles_post_ra>
